<compile_context>
chip_gen: v7x
topology: tpu7x:2x2x1
jax: 0.10.0
libtpu: 0.0.40
codegen_flags: <defaults>
</compile_context>

<pallas_src>
import functools

import jax
import jax.numpy as jnp
from jax.experimental import pallas as pl
from jax.experimental.pallas import tpu as pltpu


def _round_up(n, m):
    return ((n + m - 1) // m) * m


_TARGET_TB = 2048                      # target rows per grid step
_VMEM_BUDGET = 28 * 1024 * 1024        # keep under 32 MiB default scoped VMEM (v7x)


# ---------------------------------------------------------------------------
# Kernel
# ---------------------------------------------------------------------------
def encoder_kernel(o_dim, mxu_dtype, x_ref, w1_ref, b1_ref, w2_ref, b2_ref,
                   wh_ref, bh_ref, out_ref):
    # MXU operands in `mxu_dtype` (bf16 by default), f32 accumulation.
    # If the caller already delivers bf16 x, this cast is a register no-op.
    x = x_ref[...].astype(mxu_dtype)

    h1 = jnp.tanh(
        jnp.dot(x, w1_ref[...], preferred_element_type=jnp.float32)
        + b1_ref[...])
    h2 = jnp.tanh(
        jnp.dot(h1.astype(mxu_dtype), w2_ref[...],
                preferred_element_type=jnp.float32)
        + b2_ref[...])

    # Fused mu / logsigma head: a single MXU matmul over a 128-lane-padded N.
    head = (jnp.dot(h2.astype(mxu_dtype), wh_ref[...],
                    preferred_element_type=jnp.float32)
            + bh_ref[...])

    # Columns [0, O) hold mu, [O, 2O) hold logsigma (exp'ed -> sigma),
    # [2O, OUTP) is padding the wrapper never reads.  exp is evaluated on ALL
    # lanes on the EUP (free slack) and discarded by the elementwise select;
    # padded lanes are exactly 0 (zero weight cols / bias), so exp there is 1.
    # One full-width, lane-dense (tb, OUTP) store -> unmasked 128-lane vst.
    col = jax.lax.broadcasted_iota(jnp.int32, head.shape, dimension=1)
    out_ref[...] = jnp.where(col >= o_dim, jnp.exp(head), head).astype(out_ref.dtype)


# ---------------------------------------------------------------------------
# Parameter packing (pad hidden dim to 128, fuse + lane-pad the two heads)
# ---------------------------------------------------------------------------
def pack_params(params, mxu_dtype=jnp.bfloat16):
    D, H = params["w1"].shape
    O = params["wmu"].shape[1]
    Hp = _round_up(H, 128)
    OUTP = _round_up(2 * O, 128)

    def pad2(a, rows, cols):
        return jnp.pad(a, ((0, rows - a.shape[0]), (0, cols - a.shape[1])))

    # Padded weight rows/cols are zero, and tanh(0) = 0, so padded hidden
    # columns stay exactly zero through both hidden layers.
    w1 = pad2(params["w1"], D, Hp).astype(mxu_dtype)
    b1 = pad2(params["b1"], 1, Hp).astype(jnp.float32)
    w2 = pad2(params["w2"], Hp, Hp).astype(mxu_dtype)
    b2 = pad2(params["b2"], 1, Hp).astype(jnp.float32)
    wh = pad2(jnp.concatenate([params["wmu"], params["wls"]], axis=1),
              Hp, OUTP).astype(mxu_dtype)
    bh = pad2(jnp.concatenate([params["bmu"], params["bls"]], axis=1),
              1, OUTP).astype(jnp.float32)
    return {"w1": w1, "b1": b1, "w2": w2, "b2": b2, "wh": wh, "bh": bh}


# ---------------------------------------------------------------------------
# Batch-tile selection
# ---------------------------------------------------------------------------
def _choose_batch_tile(B, sub, x_itemsize, D, OUTP, weight_bytes,
                       target=_TARGET_TB):
    # (a) VMEM cap: double-buffered x + out tiles plus double-buffered
    #     weights must fit the scoped-VMEM budget on every generation.
    per_row = 2 * (D * x_itemsize + OUTP * 4)
    budget = max(_VMEM_BUDGET - 2 * weight_bytes, per_row * sub)
    max_rows = max(budget // per_row, sub)
    target = max(min(target, (max_rows // sub) * sub), sub)

    # (b) balance the tiles over the batch (padding waste < one sublane group)
    #     and keep >= 2 grid steps when B allows, so the single "parallel"
    #     grid axis splits across both v7x TensorCores.
    n_steps = pl.cdiv(B, target)
    if B >= 2 * sub:
        n_steps = max(n_steps, 2)
    tb = _round_up(pl.cdiv(B, n_steps), sub)
    return min(tb, _round_up(B, sub))


# ---------------------------------------------------------------------------
# Wrapper
# ---------------------------------------------------------------------------
def encoder_forward(x, params, *, batch_tile=None, mxu_dtype=jnp.bfloat16,
                    return_fused=False):
    """Runs the Encoder forward pass as a single Pallas kernel.

    x: (B, input_dim) float32 or bfloat16.  For best HBM throughput on
       v5e/v6e, deliver x already in bfloat16 (fuse the downcast upstream).
    params: dict with w1 (D,H), b1 (1,H), w2 (H,H), b2 (1,H),
            wmu (H,O), bmu (1,O), wls (H,O), bls (1,O)   (float32)
    returns: (mu, sigma) each (B, O) float32, or the fused (B, 2*O) slab
             [mu | sigma] if return_fused=True.
    """
    B, D = x.shape
    O = params["wmu"].shape[1]

    packed = pack_params(params, mxu_dtype)
    Hp = packed["w1"].shape[1]
    OUTP = packed["wh"].shape[1]
    weight_bytes = sum(int(a.size) * a.dtype.itemsize for a in packed.values())

    # Sublane group: 8 rows for 32-bit x, 16 for 16-bit, 32 for 8-bit.
    sub = max(8, 32 // jnp.dtype(x.dtype).itemsize)

    if batch_tile is None:
        tb = _choose_batch_tile(B, sub, jnp.dtype(x.dtype).itemsize, D, OUTP,
                                weight_bytes)
    else:
        if batch_tile % sub != 0:
            raise ValueError(f"batch_tile must be a multiple of {sub} for "
                             f"{jnp.dtype(x.dtype).name} inputs")
        tb = batch_tile

    grid_steps = pl.cdiv(B, tb)
    B_pad = grid_steps * tb
    if B_pad != B:
        x = jnp.pad(x, ((0, B_pad - B), (0, 0)))

    kernel = functools.partial(encoder_kernel, O, mxu_dtype)

    out = pl.pallas_call(
        kernel,
        out_shape=jax.ShapeDtypeStruct((B_pad, OUTP), jnp.float32),
        grid_spec=pltpu.PrefetchScalarGridSpec(
            num_scalar_prefetch=0,
            grid=(grid_steps,),
            in_specs=[
                pl.BlockSpec((tb, D), lambda i: (i, 0)),        # x (batch tiled)
                pl.BlockSpec((D, Hp), lambda i: (0, 0)),        # w1 (constant block)
                pl.BlockSpec((1, Hp), lambda i: (0, 0)),        # b1
                pl.BlockSpec((Hp, Hp), lambda i: (0, 0)),       # w2
                pl.BlockSpec((1, Hp), lambda i: (0, 0)),        # b2
                pl.BlockSpec((Hp, OUTP), lambda i: (0, 0)),     # fused head W
                pl.BlockSpec((1, OUTP), lambda i: (0, 0)),      # fused head b
            ],
            out_specs=pl.BlockSpec((tb, OUTP), lambda i: (i, 0)),
        ),
        compiler_params=pltpu.CompilerParams(
            dimension_semantics=("parallel",),
        ),
    )(x, packed["w1"], packed["b1"], packed["w2"], packed["b2"],
      packed["wh"], packed["bh"])

    # Single contiguous slice of the lane-padded slab (drops padded batch rows
    # and padded lanes in one pass); split mu/sigma from the small slab only.
    fused = out[:B, :2 * O]
    if return_fused:
        return fused
    return fused[:, :O], fused[:, O:]


# ---------------------------------------------------------------------------
# Init + reference
# ---------------------------------------------------------------------------
def init_params(key, input_dim, hidden_dim, output_dim):
    """Deterministic synthetic init (PyTorch-Linear-like uniform fan-in scaling)."""
    ks = jax.random.split(key, 8)

    def lin(kw, kb, fan_in, fan_out):
        bound = 1.0 / jnp.sqrt(fan_in)
        w = jax.random.uniform(kw, (fan_in, fan_out), jnp.float32, -bound, bound)
        b = jax.random.uniform(kb, (1, fan_out), jnp.float32, -bound, bound)
        return w, b

    w1, b1 = lin(ks[0], ks[1], input_dim, hidden_dim)
    w2, b2 = lin(ks[2], ks[3], hidden_dim, hidden_dim)
    wmu, bmu = lin(ks[4], ks[5], hidden_dim, output_dim)
    wls, bls = lin(ks[6], ks[7], hidden_dim, output_dim)
    return {
        "w1": w1, "b1": b1,
        "w2": w2, "b2": b2,
        "wmu": wmu, "bmu": bmu,
        "wls": wls, "bls": bls,
    }


def encoder_ref(x, p):
    """Pure-JAX f32 reference for correctness checking."""
    h1 = jnp.tanh(x @ p["w1"] + p["b1"])
    h2 = jnp.tanh(h1 @ p["w2"] + p["b2"])
    mu = h2 @ p["wmu"] + p["bmu"]
    sigma = jnp.exp(h2 @ p["wls"] + p["bls"])
    return mu, sigma


if __name__ == "__main__":
    # Small shapes consistent with the module (original: 784 / 200 / 50).
    # batch=24 exercises a 2-step grid (balanced tb=16) plus batch padding.
    batch, input_dim, hidden_dim, output_dim = 24, 64, 32, 16

    key = jax.random.PRNGKey(0)
    kx, kp = jax.random.split(key)
    x = jax.random.normal(kx, (batch, input_dim), jnp.float32)
    params = init_params(kp, input_dim, hidden_dim, output_dim)

    mu_ref, sigma_ref = encoder_ref(x, params)

    # f32-x path (bf16 MXU operands, f32 accumulation).
    mu, sigma = encoder_forward(x, params)
    jax.block_until_ready((mu, sigma))
    assert mu.shape == (batch, output_dim) and sigma.shape == (batch, output_dim)
    assert jnp.allclose(mu, mu_ref, atol=3e-2, rtol=3e-2)
    assert jnp.allclose(sigma, sigma_ref, atol=3e-2, rtol=3e-2)

    # bf16-x fast path (the caller/producer delivers bf16; halves the dominant
    # HBM stream on v5e/v6e).  Looser tolerance for the bf16 input quantization.
    mu_b, sigma_b = encoder_forward(x.astype(jnp.bfloat16), params)
    jax.block_until_ready((mu_b, sigma_b))
    assert jnp.allclose(mu_b, mu_ref, atol=1e-1, rtol=1e-1)
    assert jnp.allclose(sigma_b, sigma_ref, atol=1e-1, rtol=1e-1)

    print("KERNEL_OK")
</pallas_src>

<mosaic_0001>
module attributes {stable_mosaic.version = 11 : i64} {
  func.func @encoder_kernel(%arg0: i32, %arg1: memref<16x64xf32, #tpu.memory_space<vmem>>, %arg2: memref<64x128xbf16, #tpu.memory_space<vmem>>, %arg3: memref<1x128xf32, #tpu.memory_space<vmem>>, %arg4: memref<128x128xbf16, #tpu.memory_space<vmem>>, %arg5: memref<1x128xf32, #tpu.memory_space<vmem>>, %arg6: memref<128x128xbf16, #tpu.memory_space<vmem>>, %arg7: memref<1x128xf32, #tpu.memory_space<vmem>>, %arg8: memref<16x128xf32, #tpu.memory_space<vmem>>) attributes {dimension_semantics = [#tpu.dimension_semantics<parallel>], iteration_bounds = array<i64: 2>, scalar_prefetch = 0 : i64, scratch_operands = 0 : i64, tpu.core_type = #tpu.core_type<tc>, window_params = [{transform_indices = @transform_0, window_bounds = array<i64: 16, 64>}, {pipeline_mode = #tpu.pipeline_mode<synchronous>, transform_indices = @transform_1, window_bounds = array<i64: 64, 128>}, {pipeline_mode = #tpu.pipeline_mode<synchronous>, transform_indices = @transform_2, window_bounds = array<i64: 1, 128>}, {pipeline_mode = #tpu.pipeline_mode<synchronous>, transform_indices = @transform_3, window_bounds = array<i64: 128, 128>}, {pipeline_mode = #tpu.pipeline_mode<synchronous>, transform_indices = @transform_4, window_bounds = array<i64: 1, 128>}, {pipeline_mode = #tpu.pipeline_mode<synchronous>, transform_indices = @transform_5, window_bounds = array<i64: 128, 128>}, {pipeline_mode = #tpu.pipeline_mode<synchronous>, transform_indices = @transform_6, window_bounds = array<i64: 1, 128>}, {transform_indices = @transform_7, window_bounds = array<i64: 16, 128>}]} {
    %c0 = arith.constant 0 : index
    %c0_0 = arith.constant 0 : index
    %0 = vector.load %arg1[%c0, %c0_0] : memref<16x64xf32, #tpu.memory_space<vmem>>, vector<16x64xf32>
    %1 = arith.truncf %0 : vector<16x64xf32> to vector<16x64xbf16>
    %c0_1 = arith.constant 0 : index
    %c0_2 = arith.constant 0 : index
    %2 = vector.load %arg2[%c0_1, %c0_2] : memref<64x128xbf16, #tpu.memory_space<vmem>>, vector<64x128xbf16>
    %cst = arith.constant dense<0.000000e+00> : vector<16x128xf32>
    %3 = tpu.matmul %1, %2, %cst {dimension_numbers = #tpu.dot_dimension_numbers<[1], [0], [0], [1], [0, 0, 1, 1], [], []>} : vector<16x64xbf16>, vector<64x128xbf16>, vector<16x128xf32> -> vector<16x128xf32>
    %c0_3 = arith.constant 0 : index
    %c0_4 = arith.constant 0 : index
    %4 = vector.load %arg3[%c0_3, %c0_4] : memref<1x128xf32, #tpu.memory_space<vmem>>, vector<1x128xf32>
    %5 = vector.broadcast %4 : vector<1x128xf32> to vector<16x128xf32>
    %6 = arith.addf %3, %5 : vector<16x128xf32>
    %7 = math.tanh %6 : vector<16x128xf32>
    %8 = arith.truncf %7 : vector<16x128xf32> to vector<16x128xbf16>
    %c0_5 = arith.constant 0 : index
    %c0_6 = arith.constant 0 : index
    %9 = vector.load %arg4[%c0_5, %c0_6] : memref<128x128xbf16, #tpu.memory_space<vmem>>, vector<128x128xbf16>
    %cst_7 = arith.constant dense<0.000000e+00> : vector<16x128xf32>
    %10 = tpu.matmul %8, %9, %cst_7 {dimension_numbers = #tpu.dot_dimension_numbers<[1], [0], [0], [1], [0, 0, 1, 1], [], []>} : vector<16x128xbf16>, vector<128x128xbf16>, vector<16x128xf32> -> vector<16x128xf32>
    %c0_8 = arith.constant 0 : index
    %c0_9 = arith.constant 0 : index
    %11 = vector.load %arg5[%c0_8, %c0_9] : memref<1x128xf32, #tpu.memory_space<vmem>>, vector<1x128xf32>
    %12 = vector.broadcast %11 : vector<1x128xf32> to vector<16x128xf32>
    %13 = arith.addf %10, %12 : vector<16x128xf32>
    %14 = math.tanh %13 : vector<16x128xf32>
    %15 = arith.truncf %14 : vector<16x128xf32> to vector<16x128xbf16>
    %c0_10 = arith.constant 0 : index
    %c0_11 = arith.constant 0 : index
    %16 = vector.load %arg6[%c0_10, %c0_11] : memref<128x128xbf16, #tpu.memory_space<vmem>>, vector<128x128xbf16>
    %cst_12 = arith.constant dense<0.000000e+00> : vector<16x128xf32>
    %17 = tpu.matmul %15, %16, %cst_12 {dimension_numbers = #tpu.dot_dimension_numbers<[1], [0], [0], [1], [0, 0, 1, 1], [], []>} : vector<16x128xbf16>, vector<128x128xbf16>, vector<16x128xf32> -> vector<16x128xf32>
    %c0_13 = arith.constant 0 : index
    %c0_14 = arith.constant 0 : index
    %18 = vector.load %arg7[%c0_13, %c0_14] : memref<1x128xf32, #tpu.memory_space<vmem>>, vector<1x128xf32>
    %19 = vector.broadcast %18 : vector<1x128xf32> to vector<16x128xf32>
    %20 = arith.addf %17, %19 : vector<16x128xf32>
    %21 = tpu.iota {dimensions = array<i32: 1>} : vector<16x128xi32>
    %c16_i32 = arith.constant 16 : i32
    %22 = vector.broadcast %c16_i32 : i32 to vector<16x128xi32>
    %23 = arith.cmpi sge, %21, %22 : vector<16x128xi32>
    %24 = math.exp %20 : vector<16x128xf32>
    %25 = arith.select %23, %24, %20 : vector<16x128xi1>, vector<16x128xf32>
    %c0_15 = arith.constant 0 : index
    %c0_16 = arith.constant 0 : index
    %26 = vector.load %arg8[%c0_15, %c0_16] : memref<16x128xf32, #tpu.memory_space<vmem>>, vector<16x128xf32>
    tpu.vector_store %arg8[%c0_15, %c0_16], %25 {strides = array<i32>} : memref<16x128xf32, #tpu.memory_space<vmem>>, vector<16x128xf32>,
    return
  }
  func.func @transform_0(%arg0: i32) -> (i32, i32) {
    %c0_i32 = arith.constant 0 : i32
    %c0_i32_0 = arith.constant 0 : i32
    return %arg0, %c0_i32 : i32, i32
  }
  func.func @transform_1(%arg0: i32) -> (i32, i32) {
    %c0_i32 = arith.constant 0 : i32
    %c0_i32_0 = arith.constant 0 : i32
    %c0_i32_1 = arith.constant 0 : i32
    return %c0_i32, %c0_i32_0 : i32, i32
  }
  func.func @transform_2(%arg0: i32) -> (i32, i32) {
    %c0_i32 = arith.constant 0 : i32
    %c0_i32_0 = arith.constant 0 : i32
    %c0_i32_1 = arith.constant 0 : i32
    return %c0_i32, %c0_i32_0 : i32, i32
  }
  func.func @transform_3(%arg0: i32) -> (i32, i32) {
    %c0_i32 = arith.constant 0 : i32
    %c0_i32_0 = arith.constant 0 : i32
    %c0_i32_1 = arith.constant 0 : i32
    return %c0_i32, %c0_i32_0 : i32, i32
  }
  func.func @transform_4(%arg0: i32) -> (i32, i32) {
    %c0_i32 = arith.constant 0 : i32
    %c0_i32_0 = arith.constant 0 : i32
    %c0_i32_1 = arith.constant 0 : i32
    return %c0_i32, %c0_i32_0 : i32, i32
  }
  func.func @transform_5(%arg0: i32) -> (i32, i32) {
    %c0_i32 = arith.constant 0 : i32
    %c0_i32_0 = arith.constant 0 : i32
    %c0_i32_1 = arith.constant 0 : i32
    return %c0_i32, %c0_i32_0 : i32, i32
  }
  func.func @transform_6(%arg0: i32) -> (i32, i32) {
    %c0_i32 = arith.constant 0 : i32
    %c0_i32_0 = arith.constant 0 : i32
    %c0_i32_1 = arith.constant 0 : i32
    return %c0_i32, %c0_i32_0 : i32, i32
  }
  func.func @transform_7(%arg0: i32) -> (i32, i32) {
    %c0_i32 = arith.constant 0 : i32
    %c0_i32_0 = arith.constant 0 : i32
    return %arg0, %c0_i32 : i32, i32
  }
}

</mosaic_0001>

<bundles_post_ra>
// kernel: tpu_custom_call.1
= control target key start
LH: loop header
LB: loop body
LE: loop exit
PB: predicated region body
PF: predicated region fallthrough
CT: control target
= control target key end

     0   :  { %12 = vsyncpa [#allocation3], 0  ;;  %s1576_s0 = inlined_call_operand.hbm [shape: f32[32,64], index: 0, kind: input, shape index: {}]   ;;  %s1577_s1 = inlined_call_operand.hbm [shape: bf16[64,128], index: 1, kind: input, shape index: {}]   ;;  %s1578_s2 = inlined_call_operand.vmem [shape: f32[1,128], index: 2, kind: input, shape index: {}]   ;;  %s1579_s3 = inlined_call_operand.hbm [shape: bf16[128,128], index: 3, kind: input, shape index: {}]   ;;  %s1580_s4 = inlined_call_operand.vmem [shape: f32[1,128], index: 4, kind: input, shape index: {}]   ;;  %s1581_s5 = inlined_call_operand.hbm [shape: bf16[128,128], index: 5, kind: input, shape index: {}]   ;;  %s1582_s6 = inlined_call_operand.vmem [shape: f32[1,128], index: 6, kind: input, shape index: {}]   ;;  %s1583_s7 = inlined_call_operand.hbm [shape: f32[32,128], index: 7, kind: output, shape index: {}]  }
   0x1   :  { %14 = vsyncpa [#allocation3 + $0x1], 0 }
   0x2   :  { %15 = vsyncpa [#allocation6], 0 }
   0x3   :  { %16 = vsyncpa [#allocation9], 0 }
   0x4   :  { %17 = vsyncpa [#allocation4], 0 }
   0x5   :  { %19 = vsyncpa [#allocation4 + $0x1], 0  ;;  %s1269_s24 = smov 0   ;;  %s1271_s25 = smov 0  }
   0x6   :  { %s1273_s26 = smov 0   ;;  %s1275_s27 = smov 0  }
   0x7 LB: > { %s1290_s28 = sadd.s32 4294967295, %s1214_s27   ;;  %s788_s29 = sadd.s32 4294967294, %s1214_s27   ;;  %s1214_s27 = sphi %s1275_s27, %s1609_s27   ;;  %s1210_s26 = sphi %s1273_s26, %s1608_s26   ;;  %s1206_s25 = sphi %s1271_s25, %s1607_s25   ;;  %s1202_s24 = sphi %s1269_s24, %s1606_s24  }
   0x8   : > { %p45_p0 = scmp.ne.s32.totalorder %s1206_s25, %s1202_s24  ;;  %p1584_p1 = scmp.eq.s32.totalorder %s1290_s28, 0 }
   0x9   : > { %p201_p3 = scmp.eq.s32.totalorder %s788_s29, 1  ;;  %p789_p5 = scmp.ge.s32.totalorder %s1214_s27, 1 }
   0xa   : > { %p1299_p4 = por %p1584_p1, %p45_p0  ;;  %p208_p7 = scmp.lt.s32.totalorder %s1214_s27, 3 }
   0xb   : > { %p1304_p6 = por %p201_p3, %p45_p0  ;;  %s1216_s10 = smov [#allocation5]  }
   0xc   : > { %s1588_s30 = scalar_select %p1299_p4, 1, 0 }
   0xd   : > { %s1589_s8 = scalar_select %p1304_p6, 1, 0 }
   0xe   : > { %p1309_p8 = pnand %p789_p5, %p208_p7  ;;  %s220_s11 = sshll.u32 %s1216_s10, 4  ;;  %s1313_s11 = int_to_ptr.vmem [resolvable:$true] %s220_s11 }
   0xf   : > { %1590 = sst [smem:[#allocation15_spill]] %s1589_s8  ;;  %s1217_s13 = smov [#allocation7]  }
  0x10   : > { %s1591_s9 = scalar_select %p1309_p8, 1, 0 }
  0x11   : > { %p925_p9 = pneg %p1309_p8  ;;  %s236_s14 = sshll.u32 %s1217_s13, 4  ;;  %s1324_s14 = int_to_ptr.vmem [resolvable:$true] %s236_s14 }
  0x12   : > { %s1218_s15 = smov [#allocation8]   ;;  %s1026_s19 = scalar_lea.hbm %s1577_s1, 512 }
  0x13   : > { %p1320_p11 = pnand %p925_p9, %p1584_p1  ;;  %s1326_s16 = sshll.u32 %s1218_s15, 4  ;;  %s253_s16 = int_to_ptr.vmem [resolvable:$true] %s1326_s16 }
  0x14   : > { %p1027_p12 = scmp.ne.s32.totalorder %s1577_s1, %s1026_s19  ;;  %p1033_p5 = scmp.lt.u32.totalorder %s1026_s19, %s1577_s1 }
  0x15   : > { %p1336_p13 = pneg %p1320_p11 }
  0x17   : > { %p1029_p0 = pnand %p1336_p13, %p1027_p12 }
  0x19   : > { %p1030_p3 = pneg %p1029_p0 }
  0x1b   : > { %p1035_p7 = pnand %p1033_p5, %p1030_p3 }
  0x1d   : > { %1038 = shalt.err (!%p1035_p7)
}
  0x1e   : > { %s1039_s10 = scalar_lea.vmem %s1313_s11, 512  ;;  %p1047_p2 = scmp.lt.s32.totalorder %s1313_s11, %s1313_s11 }
  0x1f   : > { %p1040_p9 = scmp.ne.s32.totalorder %s1313_s11, %s1039_s10  ;;  %p1048_p6 = scmp.lt.s32.totalorder %s1039_s10, %s1039_s10 }
  0x21   : > { %p1042_p10 = pnand %p1040_p9, %p1336_p13  ;;  %p1049_p12 = por %p1048_p6, %p1047_p2 }
  0x23   : > { %p1043_p1 = pneg %p1042_p10 }
  0x25   : > { %p1050_p0 = pnand %p1049_p12, %p1043_p1 }
  0x27   : > { %1053 = shalt.err (!%p1050_p0)
}
  0x28   : > { %s1219_s13 = smov 64   ;;  %s1220_s15 = smov 4  }
  0x29   : > { %928 = dma.hbm_to_vmem [thread:$0]  (!%p1320_p11), %s1577_s1, 512, %s1313_s11, [#allocation6], %s1219_s13, %s1219_s13, %s1220_s15  }
  0x2a   : > { %s1054_s21 = scalar_lea.hbm %s1579_s3, 1024 }
  0x2b   : > { %p1055_p1 = scmp.ne.s32.totalorder %s1579_s3, %s1054_s21  ;;  %p1061_p10 = scmp.lt.u32.totalorder %s1054_s21, %s1579_s3 }
  0x2d   : > { %p1057_p2 = pnand %p1055_p1, %p1336_p13 }
  0x2f   : > { %p1058_p6 = pneg %p1057_p2 }
  0x31   : > { %p1063_p3 = pnand %p1061_p10, %p1058_p6 }
  0x33   : > { %1066 = shalt.err (!%p1063_p3)
}
  0x34   : > { %s1067_s11 = scalar_lea.vmem %s1324_s14, 1024  ;;  %p1075_p12 = scmp.lt.s32.totalorder %s1324_s14, %s1324_s14 }
  0x35   : > { %p1068_p5 = scmp.ne.s32.totalorder %s1324_s14, %s1067_s11  ;;  %p1076_p0 = scmp.lt.s32.totalorder %s1067_s11, %s1067_s11 }
  0x37   : > { %p1070_p7 = pnand %p1068_p5, %p1336_p13  ;;  %p1077_p1 = por %p1076_p0, %p1075_p12 }
  0x39   : > { %p1071_p9 = pneg %p1070_p7 }
  0x3b   : > { %p1078_p2 = pnand %p1077_p1, %p1071_p9 }
  0x3d   : > { %1081 = shalt.err (!%p1078_p2)
}
  0x3e   : > { %931 = dma.hbm_to_vmem [thread:$0]  (!%p1320_p11), %s1579_s3, 1024, %s1324_s14, [#allocation6], %s1219_s13, %s1219_s13, %s1220_s15  }
  0x3f   : > { %s1082_s20 = scalar_lea.hbm %s1581_s5, 1024 }
  0x40   : > { %p1083_p6 = scmp.ne.s32.totalorder %s1581_s5, %s1082_s20  ;;  %p1089_p5 = scmp.lt.u32.totalorder %s1082_s20, %s1581_s5 }
  0x42   : > { %p1085_p10 = pnand %p1083_p6, %p1336_p13 }
  0x44   : > { %p1086_p3 = pneg %p1085_p10 }
  0x46   : > { %p1091_p7 = pnand %p1089_p5, %p1086_p3 }
  0x48   : > { %1094 = shalt.err (!%p1091_p7)
}
  0x49   : > { %s1095_s11 = scalar_lea.vmem %s253_s16, 1024  ;;  %p1103_p1 = scmp.lt.s32.totalorder %s253_s16, %s253_s16 }
  0x4a   : > { %p1096_p9 = scmp.ne.s32.totalorder %s253_s16, %s1095_s11  ;;  %p1104_p2 = scmp.lt.s32.totalorder %s1095_s11, %s1095_s11 }
  0x4c   : > { %p1098_p12 = pnand %p1096_p9, %p1336_p13  ;;  %p1105_p4 = por %p1104_p2, %p1103_p1 }
  0x4e   : > { %p1099_p0 = pneg %p1098_p12 }
  0x50   : > { %p1106_p8 = pnand %p1105_p4, %p1099_p0 }
  0x52   : > { %1109 = shalt.err (!%p1106_p8)
}
  0x53   : > { %934 = dma.hbm_to_vmem [thread:$0]  (!%p1320_p11), %s1581_s5, 1024, %s253_s16, [#allocation9], %s1219_s13, %s1219_s13, %s1220_s15  }
  0x54   : > { %s1409_s22 = sadd.s32 1, %s1214_s27   ;;  %s32_s17 = sadd.s32 1, %s1210_s26 }
  0x55   : > { %s29_s12 = ssub.s32 %s1214_s27, %s1409_s22  ;;  %p39_p8 = scmp.ne.s32.totalorder %s1210_s26, %s1206_s25 }
  0x56   : > { %p30_p4 = scmp.eq.s32.totalorder %s29_s12, 0  ;;  %p40_p13 = scmp.eq.s32.totalorder %s1214_s27, 0 }
  0x57   : > { %p946_p6 = scmp.lt.s32.totalorder %s1214_s27, 2  ;;  %p1594_p3 = scmp.eq.s32.totalorder %s1290_s28, 1 }
  0x58   : > { %s1419_s18 = scalar_select %p30_p4, %s1210_s26, %s32_s17  }
  0x59   : > { %p41_p10 = por %p40_p13, %p39_p8  ;;  %p1423_p5 = por %p1594_p3, %p39_p8 }
  0x5a   : > { %s269_s20 = sand.u32 1, %s1210_s26   ;;  %s832_s21 = sshll.u32 %s1214_s27, 8 }
  0x5b   : > { %s794_s16 = sshll.u32 %s269_s20, 4  ;;  %s1432_s23 = scalar_lea.hbm %s1576_s0, %s832_s21 }
  0x5c   : > { %s273_s29 = scalar_lea.vmem [#allocation2], %s794_s16  ;;  %p1434_p11 = pnand %p946_p6, %p41_p10 }
  0x5d   : > { %s280_s10 = sshll.u32 %s273_s29, 4  ;;  %s1440_s14 = scalar_lea.sflag [#allocation3], %s269_s20  ;;  %s1438_s10 = int_to_ptr.vmem [resolvable:$true] %s280_s10 }
  0x5e   : > { %s1110_s8 = scalar_lea.hbm %s1432_s23, 256  ;;  %p1112_p9 = pneg %p1434_p11 }
  0x5f   : > { %p1111_p7 = scmp.ne.s32.totalorder %s1432_s23, %s1110_s8  ;;  %s1115_s21 = scalar_lea.hbm %s1576_s0, 512 }
  0x60   : > { %p1116_p1 = scmp.lt.u32.totalorder %s1432_s23, %s1576_s0  ;;  %p1117_p2 = scmp.lt.u32.totalorder %s1115_s21, %s1110_s8 }
  0x61   : > { %p1113_p12 = pnand %p1112_p9, %p1111_p7  ;;  %p1119_p8 = scmp.lt.u32.totalorder %s1110_s8, %s1432_s23 }
  0x62   : > { %p1118_p4 = por %p1117_p2, %p1116_p1 }
  0x63   : > { %p1114_p0 = pneg %p1113_p12 }
  0x64   : > { %p1120_p13 = por %p1119_p8, %p1118_p4 }
  0x66   : > { %p1121_p6 = pnand %p1120_p13, %p1114_p0 }
  0x68   : > { %1124 = shalt.err (!%p1121_p6)
}
  0x69   : > { %s1125_s20 = scalar_lea.vmem %s1438_s10, 256  ;;  %s1221_s15 = smov [#allocation2]  }
  0x6a   : > { %p1126_p10 = scmp.ne.s32.totalorder %s1438_s10, %s1125_s20  ;;  %s1130_s29 = sshll.u32 %s1221_s15, 4  ;;  %s1131_s29 = int_to_ptr.vmem [resolvable:$false] %s1130_s29 }
  0x6b   : > { %s1132_s12 = scalar_lea.vmem %s1131_s29, 512  ;;  %p1133_p12 = scmp.lt.s32.totalorder %s1438_s10, %s1131_s29 }
  0x6c   : > { %p1128_p3 = pnand %p1126_p10, %p1112_p9  ;;  %p1134_p1 = scmp.lt.s32.totalorder %s1132_s12, %s1125_s20 }
  0x6e   : > { %p1129_p7 = pneg %p1128_p3  ;;  %p1135_p2 = por %p1134_p1, %p1133_p12 }
  0x70   : > { %p1136_p4 = pnand %p1135_p2, %p1129_p7 }
  0x72   : > { %1139 = shalt.err (!%p1136_p4)
}
  0x73   : > { %s1222_s8 = smov 128   ;;  %s1223_s17 = smov 8  }
  0x74   : > { %938 = dma.hbm_to_vmem [thread:$0]  (!%p1434_p11), %s1432_s23, 256, %s1438_s10, %s1440_s14, %s1222_s8, %s1222_s8, %s1223_s17  }
  0x75   : > { %p1597_p9 = scmp.ne.s32.totalorder %s1591_s9, 0 }
  0x76   : > { %s1471_s21 = sand.u32 (!%p1597_p9), 1, %s1206_s25   ;;  %p1598_p0 = scmp.ne.s32.totalorder (!%p1597_p9), %s1588_s30, 0 }
  0x77   : > { %292 = sbr.rel (%p1597_p9) target bundleno = 855 (0x357), region = 48  ;;  %s798_s16 = sshll.u32 (!%p1597_p9), %s1471_s21, 4 }
  0x78   : > { %s295_s13 = scalar_lea.sflag (!%p1597_p9), [#allocation3], %s1471_s21  ;;  %s298_s20 = scalar_lea.vmem (!%p1597_p9), [#allocation2], %s798_s16 }
  0x7e   : > { %1185 = dma.done.wait (%p1598_p0), %s295_s13, 256  }
  0x7f   : > { %1187 = vsyncadd (%p1598_p0), %s295_s13, 4294967040  ;;  %p1599_p11 = scmp.eq.s32.totalorder %s1290_s28, 0 }
  0x81   : > { %1189 = dma.done.wait (%p1599_p11), [#allocation6], 1536   ;;  %p1600_p8 = pmov %p1599_p11 }
  0x83   : > { %1191 = vsyncadd (%p1600_p8), [#allocation6], 4294965760  ;;  %p1601_p13 = pmov %p1600_p8 }
  0x84   : > { %p1602_p6 = pmov %p1600_p8 }
  0x85   : > { %1193 = dma.done.wait (%p1601_p13), [#allocation9], 1024  }
  0x86   : > { %1195 = vsyncadd (%p1602_p6), [#allocation9], 4294966272  ;;  %v1224_v0 = vmov 0.0   ;;  %vm1225_vm0 = vmmov 0   ;;  %v994_v1 = vld [vmem:[#allocation5] sm:$0xff]   ;;  %v995_v2 = vld [vmem:[#allocation5 + $0x8] sm:$0xff]   ;;  %v661_v52 = vlaneseq }
  0x87   : > { %857 = vmatprep.subr.bf16.mxu0 %v1224_v0  ;;  %865 = vmatprep.mubr.msk.bf16.mxu0 %vm1225_vm0, %v1224_v0  ;;  %v998_v3 = vld [vmem:[#allocation7] sm:$0xff]   ;;  %v996_v4 = vld [vmem:[#allocation5 + $0x10] sm:$0xff]   ;;  %v999_v5 = vld [vmem:[#allocation7 + $0x8] sm:$0xff]   ;;  %vm386_vm1 = vcmask 523264   ;;  %s340_s15 = scalar_lea.vmem [#allocation10], %s798_s16  ;;  %s833_s12 = sshll.u32 %s1290_s28, 8 }
  0x88   : > { %869 = vmatprep.subr.bf16.mxu1 %v1224_v0  ;;  %885 = vmatprep.mubr.msk.bf16.mxu1 %vm1225_vm0, %v1224_v0  ;;  %v997_v6 = vld [vmem:[#allocation5 + $0x18] sm:$0xff]   ;;  %v344_v7 = vld [vmem:[%s298_s20] sm:$0xff]  ;;  %v1003_v13 = vld [vmem:[#allocation7 + $0x28] sm:$0xff]   ;;  %v662_v54 = vand.u32 127, %v661_v52  ;;  %s686_s29 = sshll.u32 %s340_s15, 4  ;;  %s1532_s13 = scalar_lea.hbm %s1583_s7, %s833_s12  ;;  %s1527_s29 = int_to_ptr.vmem [resolvable:$true] %s686_s29 }
  0x89   : > { %858 = vmatpush3.bf16.msra.mxu0 %v994_v1  ;;  %870 = vmatpush3.bf16.msra.mxu1 %v998_v3  ;;  %v345_v8 = vld [vmem:[%s298_s20 + $0x8] sm:$0xff]  ;;  %v1000_v9 = vld [vmem:[#allocation7 + $0x10] sm:$0xff]   ;;  %v1002_v12 = vld [vmem:[#allocation7 + $0x20] sm:$0xff]   ;;  %s673_s16 = scalar_lea.sflag [#allocation4], %s1471_s21  ;;  %s1140_s20 = scalar_lea.vmem %s1527_s29, 256 }
  0x8a   : > { %859 = vmatprep.subr.bf16.mxu0 %v1224_v0  ;;  %871 = vmatprep.subr.bf16.mxu1 %v1224_v0  ;;  %v346_v10 = vpack.c.bf16 %v345_v8, %v344_v7  ;;  %v1001_v11 = vld [vmem:[#allocation7 + $0x18] sm:$0xff]   ;;  %v1004_v14 = vld [vmem:[#allocation7 + $0x30] sm:$0xff]   ;;  %v1006_v16 = vld [vmem:[#allocation8] sm:$0xff]   ;;  %vm663_vm2 = vcmp.ge.s32.totalorder %v662_v54, 16  ;;  %p1141_p10 = scmp.ne.s32.totalorder %s1527_s29, %s1140_s20  ;;  %s1226_s28 = smov [#allocation10]  }
  0x8b   : > { %v1005_v15 = vld [vmem:[#allocation7 + $0x38] sm:$0xff]   ;;  %v1007_v17 = vld [vmem:[#allocation8 + $0x8] sm:$0xff]   ;;  %v1008_v18 = vld [vmem:[#allocation8 + $0x10] sm:$0xff]   ;;  %s1144_s30 = sshll.u32 %s1226_s28, 4  ;;  %s1145_s30 = int_to_ptr.vmem [resolvable:$false] %s1144_s30 }
  0x8c   : > { %v1009_v19 = vld [vmem:[#allocation8 + $0x18] sm:$0xff]   ;;  %v803_v20 = vld [vmem:[%s1578_s2] ss:$0 sm:$0xff]  ;;  %v1011_v31 = vld [vmem:[#allocation8 + $0x28] sm:$0xff]   ;;  %p1142_p3 = pnand %p1141_p10, %p1423_p5  ;;  %s1146_s9 = scalar_lea.vmem %s1145_s30, 512 }
  0x8d   : > { %860 = vmatpush3.bf16.msra.mxu0 %v995_v2  ;;  %872 = vmatpush3.bf16.msra.mxu1 %v999_v5  ;;  %v1010_v30 = vld [vmem:[#allocation8 + $0x20] sm:$0xff]   ;;  %v1012_v32 = vld [vmem:[#allocation8 + $0x30] sm:$0xff]   ;;  %v1013_v33 = vld [vmem:[#allocation8 + $0x38] sm:$0xff]   ;;  %p1147_p12 = scmp.lt.s32.totalorder %s1527_s29, %s1145_s30  ;;  %p1148_p1 = scmp.lt.s32.totalorder %s1146_s9, %s1140_s20 }
  0x8e   : > { %861 = vmatprep.subr.bf16.mxu0 %v1224_v0  ;;  %873 = vmatprep.subr.bf16.mxu1 %v1224_v0  ;;  %v809_v34 = vld [vmem:[%s1580_s4] ss:$0 sm:$0xff]  ;;  %p1143_p7 = pneg %p1142_p3 }
  0x8f   : > { %v818_v44 = vld [vmem:[%s1582_s6] ss:$0 sm:$0xff]  ;;  %p1149_p2 = por %p1148_p1, %p1147_p12 }
  0x91   : > { %862 = vmatpush3.bf16.msra.mxu0 %v996_v4  ;;  %874 = vmatpush3.bf16.msra.mxu1 %v1000_v9  ;;  %p1150_p4 = pnand %p1149_p2, %p1143_p7 }
  0x92   : > { %863 = vmatprep.subr.bf16.mxu0 %v1224_v0  ;;  %875 = vmatprep.subr.bf16.mxu1 %v1224_v0 }
  0x95   : > { %864 = vmatpush3.bf16.msra.mxu0 %v997_v6  ;;  %876 = vmatpush3.bf16.msra.mxu1 %v1001_v11 }
  0x96   : > { %889 = vmatprep.subr.bf16.mxu0 %v1224_v0  ;;  %877 = vmatprep.subr.bf16.mxu1 %v1224_v0 }
  0x98   : > { %866 = vmatmul.mubr.msk.bf16.vlgmr.msra.gmra.mrb[0].mxu0 %vm386_vm1, %v346_v10 }
  0x99   : > { %905 = vmatprep.mubr.msk.bf16.mxu0 %vm1225_vm0, %v1224_v0  ;;  %878 = vmatpush3.bf16.msra.mxu1 %v1002_v12 }
  0x9a   : > { %879 = vmatprep.subr.bf16.mxu1 %v1224_v0  ;;  %890 = vmatpush3.bf16.msra.mxu0 %v1006_v16 }
  0x9b   : > { %891 = vmatprep.subr.bf16.mxu0 %v1224_v0 }
  0x9d   : > { %880 = vmatpush3.bf16.msra.mxu1 %v1003_v13 }
  0x9e   : > { %881 = vmatprep.subr.bf16.mxu1 %v1224_v0  ;;  %892 = vmatpush3.bf16.msra.mxu0 %v1007_v17 }
  0x9f   : > { %893 = vmatprep.subr.bf16.mxu0 %v1224_v0 }
  0xa1   : > { %882 = vmatpush3.bf16.msra.mxu1 %v1004_v14 }
  0xa2   : > { %883 = vmatprep.subr.bf16.mxu1 %v1224_v0  ;;  %894 = vmatpush3.bf16.msra.mxu0 %v1008_v18 }
  0xa3   : > { %895 = vmatprep.subr.bf16.mxu0 %v1224_v0 }
  0xa5   : > { %884 = vmatpush3.bf16.msra.mxu1 %v1005_v15 }
  0xa6   : > { %896 = vmatpush3.bf16.msra.mxu0 %v1009_v19 }
  0xa7   : > { %897 = vmatprep.subr.bf16.mxu0 %v1224_v0 }
  0xaa   : > { %898 = vmatpush3.bf16.msra.mxu0 %v1010_v30 }
  0xab   : > { %899 = vmatprep.subr.bf16.mxu0 %v1224_v0 }
  0xae   : > { %900 = vmatpush3.bf16.msra.mxu0 %v1011_v31 }
  0xaf   : > { %901 = vmatprep.subr.bf16.mxu0 %v1224_v0 }
  0xb2   : > { %902 = vmatpush3.bf16.msra.mxu0 %v1012_v32 }
  0xb3   : > { %903 = vmatprep.subr.bf16.mxu0 %v1224_v0 }
  0xb6   : > { %904 = vmatpush3.bf16.msra.mxu0 %v1013_v33 }
 0x16b   : > { %v424_v21 = vpop.f32.mrb[0].mxu0 }
 0x16c   : > { %v425_v22 = vadd.f32 %v803_v20, %v424_v21  ;;  %v867_v23 = vpop.f32.mrb[1].mxu0 }
 0x16d   : > { %v427_v24 = vpop.f32.mrb[2].mxu0 }
 0x16e   : > { %v428_v25 = vadd.f32 %v803_v20, %v427_v24  ;;  %v868_v26 = vpop.f32.mrb[3].mxu0  ;;  %1014 = vtanh.f32 %v425_v22 }
 0x170   : > { %1016 = vtanh.f32 %v428_v25 }
 0x178   : > { %v1015_v27 = vpop.eup %1014 }
 0x17a   : > { %v1017_v28 = vpop.eup %1016 }
 0x17b   : > { %v433_v29 = vpack.c.bf16 %v1017_v28, %v1015_v27 }
 0x17d   : > { %886 = vmatmul.mubr.bf16.vlgmr.msra.gmra.mrb[0].mxu1 %v433_v29 }
 0x250   : > { %v539_v35 = vpop.f32.mrb[0].mxu1 }
 0x251   : > { %v540_v36 = vadd.f32 %v809_v34, %v539_v35  ;;  %v887_v37 = vpop.f32.mrb[1].mxu1 }
 0x252   : > { %v542_v38 = vpop.f32.mrb[2].mxu1 }
 0x253   : > { %v543_v39 = vadd.f32 %v809_v34, %v542_v38  ;;  %v888_v40 = vpop.f32.mrb[3].mxu1  ;;  %1018 = vtanh.f32 %v540_v36 }
 0x255   : > { %1020 = vtanh.f32 %v543_v39 }
 0x25d   : > { %v1019_v41 = vpop.eup %1018 }
 0x25f   : > { %v1021_v42 = vpop.eup %1020 }
 0x260   : > { %v548_v43 = vpack.c.bf16 %v1021_v42, %v1019_v41 }
 0x262   : > { %906 = vmatmul.mubr.bf16.vlgmr.msra.gmra.mrb[4].mxu0 %v548_v43 }
 0x335   : > { %v654_v45 = vpop.f32.mrb[4].mxu0 }
 0x336   : > { %v655_v46 = vadd.f32 %v818_v44, %v654_v45  ;;  %v907_v47 = vpop.f32.mrb[5].mxu0 }
 0x337   : > { %v657_v48 = vpop.f32.mrb[6].mxu0 }
 0x338   : > { %v664_v49 = vmul.f32 1.442695, %v655_v46  ;;  %v658_v50 = vadd.f32 %v818_v44, %v657_v48  ;;  %v908_v51 = vpop.f32.mrb[7].mxu0 }
 0x33a   : > { %1022 = vpow2.f32 %v664_v49  ;;  %v666_v53 = vmul.f32 1.442695, %v658_v50 }
 0x33c   : > { %1024 = vpow2.f32 %v666_v53 }
 0x344   : > { %v1023_v55 = vpop.eup %1022 }
 0x345   : > { %v668_v56 = vsel %vm663_vm2, %v1023_v55, %v655_v46 }
 0x346   : > { %v1025_v57 = vpop.eup %1024  ;;  %670 = vst [vmem:[%s340_s15] sm:$0xff] %v668_v56 }
 0x347   : > { %v669_v58 = vsel %vm663_vm2, %v1025_v57, %v658_v50 }
 0x348   : > { %671 = vst [vmem:[%s340_s15 + $0x8] sm:$0xff] %v669_v58 }
 0x349   : > { %1153 = shalt.err (!%p1150_p4)
}
 0x34a   : > { %s1154_s23 = scalar_lea.hbm %s1532_s13, 256  ;;  %s1158_s14 = scalar_lea.hbm %s1583_s7, 512 }
 0x34b   : > { %p1155_p9 = scmp.ne.s32.totalorder %s1532_s13, %s1154_s23  ;;  %p1159_p8 = scmp.lt.u32.totalorder %s1532_s13, %s1583_s7 }
 0x34c   : > { %p1160_p13 = scmp.lt.u32.totalorder %s1158_s14, %s1154_s23  ;;  %p1162_p10 = scmp.lt.u32.totalorder %s1154_s23, %s1532_s13 }
 0x34d   : > { %p1156_p0 = pnand %p1155_p9, %p1423_p5 }
 0x34e   : > { %p1161_p6 = por %p1160_p13, %p1159_p8 }
 0x34f   : > { %p1157_p11 = pneg %p1156_p0 }
 0x350   : > { %p1163_p3 = por %p1162_p10, %p1161_p6 }
 0x352   : > { %p1164_p7 = pnand %p1163_p3, %p1157_p11 }
 0x354   : > { %1167 = shalt.err (!%p1164_p7)
}
 0x355   : > { %s1227_s8 = smov 128   ;;  %s1228_s17 = smov 8  }
 0x356   : > { %923 = dma.vmem_to_hbm [thread:$0]  (%p1423_p5), %s1527_s29, 256, %s1532_s13, %s673_s16, %s1227_s8, %s1227_s8, %s1228_s17  }
 0x357 PF: > { %s1603_s20 = sld [smem:[#allocation15_spill]]  ;;  %s701_s28 = sand.u32 1, %s1202_s24  }
 0x358   : > { %p1605_p1 = scmp.ge.s32.totalorder %s1214_s27, 2  ;;  %s702_s30 = scalar_lea.sflag [#allocation4], %s701_s28 }
 0x35d   : > { %p1604_p12 = scmp.ne.s32.totalorder %s1603_s20, 0 }
 0x35f   : > { %p940_p2 = pnand %p1605_p1, %p1604_p12 }
 0x361   : > { %1197 = dma.done.wait (!%p940_p2), %s702_s30, 256  }
 0x362   : > { %1199 = vsyncadd (!%p940_p2), %s702_s30, 4294967040  ;;  %p22_p4 = scmp.ge.s32.totalorder %s1409_s22, 4   ;;  %s1606_s24 = smov %s1206_s25 }
 0x363   : > { %s1607_s25 = smov %s1210_s26  ;;  %s1608_s26 = smov %s1419_s18 }
 0x364   : > { %s1609_s27 = smov %s1409_s22  ;;  %24 = sbr.rel (!%p22_p4) target bundleno = 7 (0x7), region = 105 }
 0x36b   :  { %707 = vsyncpa [#allocation3], 1 }
 0x36c   :  { %709 = vsyncpa [#allocation3 + $0x1], 1 }
 0x36d   :  { %710 = vsyncpa [#allocation6], 1 }
 0x36e   :  { %711 = vsyncpa [#allocation9], 1 }
 0x36f   :  { %712 = vsyncpa [#allocation4], 1 }
 0x370   :  { %714 = vsyncpa [#allocation4 + $0x1], 1 }

</bundles_post_ra>
